<compile_context>
chip_gen: v5e
topology: v5e:2x2
jax: 0.10.0
libtpu: 0.0.40
codegen_flags: <defaults>
</compile_context>

<pallas_src>
import math
import functools

import jax
import jax.numpy as jnp
from jax.experimental import pallas as pl
from jax.experimental.pallas import tpu as pltpu

_LANE = 128
_SUBLANE = 8
_VMEM_TILE_BUDGET = 12 * 1024 * 1024    # double-buffered tile budget (safe on v5e/v6e/v7x)
_VMEM_LIMIT_BYTES = 32 * 1024 * 1024    # explicit scoped-VMEM limit for the kernel
_FUSED_TM_THRESHOLD = 256               # tm >= this -> MXU-bound, compose w in-kernel


# ------------------------- Pallas kernels -------------------------
# Single-pass variants (tk == full padded K): no accumulator scratch, no pl.when.

def _train_kernel_single(rank1, x_ref, wmu_ref, wsig_ref, eps_in_ref, eps_out_ref,
                         bmu_ref, bsig_ref, o_ref):
    bias = bmu_ref[...] + bsig_ref[...] * eps_out_ref[...]               # (1, tn)
    if rank1:
        # eps_in is a lane-dense (1, tk) row: scale the x tile, two MXU matmuls,
        # apply eps_out once per output column.  No (tk, tn) VPU weight composition.
        acc = jnp.dot(x_ref[...], wmu_ref[...], preferred_element_type=jnp.float32)
        acc = acc + eps_out_ref[...] * jnp.dot(
            x_ref[...] * eps_in_ref[...], wsig_ref[...],
            preferred_element_type=jnp.float32)
    else:
        # Large-tm / MXU-bound path: compose the noisy weight tile once, one matmul.
        w = wmu_ref[...] + wsig_ref[...] * (eps_in_ref[...] * eps_out_ref[...])
        acc = jnp.dot(x_ref[...], w, preferred_element_type=jnp.float32)
    o_ref[...] = (acc + bias).astype(o_ref.dtype)


def _eval_kernel_single(x_ref, wmu_ref, bmu_ref, o_ref):
    o_ref[...] = (jnp.dot(x_ref[...], wmu_ref[...], preferred_element_type=jnp.float32)
                  + bmu_ref[...]).astype(o_ref.dtype)


# Reduction variants (tk < padded K): f32 accumulator in VMEM, K axis last in grid.

def _train_kernel_reduce(rank1, x_ref, wmu_ref, wsig_ref, eps_in_ref, eps_out_ref,
                         bmu_ref, bsig_ref, o_ref, acc_ref):
    k = pl.program_id(2)

    @pl.when(k == 0)
    def _():
        acc_ref[...] = jnp.zeros_like(acc_ref)

    if rank1:
        acc_ref[...] += jnp.dot(x_ref[...], wmu_ref[...],
                                preferred_element_type=jnp.float32)
        acc_ref[...] += eps_out_ref[...] * jnp.dot(
            x_ref[...] * eps_in_ref[...], wsig_ref[...],
            preferred_element_type=jnp.float32)
    else:
        w = wmu_ref[...] + wsig_ref[...] * (eps_in_ref[...] * eps_out_ref[...])
        acc_ref[...] += jnp.dot(x_ref[...], w, preferred_element_type=jnp.float32)

    @pl.when(k == pl.num_programs(2) - 1)
    def _():
        bias = bmu_ref[...] + bsig_ref[...] * eps_out_ref[...]
        o_ref[...] = (acc_ref[...] + bias).astype(o_ref.dtype)


def _eval_kernel_reduce(x_ref, wmu_ref, bmu_ref, o_ref, acc_ref):
    k = pl.program_id(2)

    @pl.when(k == 0)
    def _():
        acc_ref[...] = jnp.zeros_like(acc_ref)

    acc_ref[...] += jnp.dot(x_ref[...], wmu_ref[...],
                            preferred_element_type=jnp.float32)

    @pl.when(k == pl.num_programs(2) - 1)
    def _():
        o_ref[...] = (acc_ref[...] + bmu_ref[...]).astype(o_ref.dtype)


# ------------------------- tiling helpers -------------------------

def _round_up(x, m):
    return ((x + m - 1) // m) * m


def _best_divisor_tile(total, unit, cap):
    """Largest multiple of `unit` that divides `total` and is <= cap (>= unit)."""
    cap = max(unit, min(cap, total))
    best = unit
    for d in range(unit, cap + 1, unit):
        if total % d == 0:
            best = d
    return best


def _pick_tiles(B, Kp, Np, n_weight_streams, max_tk=None):
    """Tiles that (a) divide the padded shapes exactly, (b) fit the VMEM budget,
    (c) keep output stores lane-dense, (d) give a >=2-wide parallel grid when possible
    (two v7x TensorCores), and (e) prefer tk == Kp so the K reduction axis vanishes."""
    # tn: lane-dense multiple of 128 that divides Np; split N when Np allows so the
    # ("parallel","parallel") part of the grid has extent >= 2.
    tn_cap = 512
    if Np >= 2 * _LANE:
        tn_cap = min(tn_cap, Np // 2)
    tn = _best_divisor_tile(Np, _LANE, tn_cap)

    # tk: prefer the full padded K (single-pass kernel, weights never revisited).
    w_budget = (_VMEM_TILE_BUDGET * 3) // 4
    tk_cap = max(_LANE, w_budget // (n_weight_streams * 2 * tn * 4))
    tk_cap = max(_LANE, (tk_cap // _LANE) * _LANE)
    if max_tk is not None:
        tk_cap = max(_LANE, min(tk_cap, max_tk))
    tk = Kp if Kp <= tk_cap else _best_divisor_tile(Kp, _LANE, tk_cap)

    # tm: cover the whole batch if it fits, so weights stream from HBM exactly once.
    x_budget = _VMEM_TILE_BUDGET - n_weight_streams * 2 * tk * tn * 4
    tm_cap = max(_SUBLANE, x_budget // (2 * tk * 4))
    tm_cap = max(_SUBLANE, (tm_cap // _SUBLANE) * _SUBLANE)
    Mp_min = _round_up(B, _SUBLANE)
    tm = max(_SUBLANE, min(Mp_min, tm_cap, 1024))
    Mp = _round_up(B, tm)
    return tm, tk, tn, Mp


# ------------------------- wrapper -------------------------

def noisy_linear_forward(x, params, *, training=True, max_tk=None):
    """Pallas forward of NoisyLinear.

    x: (B, in_features) float32
    params: dict with
      weight_mu / weight_sigma : (Kp, Np) padded once at init (in, out layout)
      bias_mu / bias_sigma     : (out_features,)
      eps_in                   : (in_features,)
      eps_out                  : (out_features,)   (== bias_epsilon)
    `max_tk` is a test hook to force a K-tiled reduction grid.
    """
    B, K = x.shape
    Kp, Np = params["weight_mu"].shape
    N = params["bias_mu"].shape[0]
    assert K <= Kp and N <= Np

    n_w = 2 if training else 1
    tm, tk, tn, Mp = _pick_tiles(B, Kp, Np, n_w, max_tk=max_tk)
    single_k = (tk == Kp)
    rank1 = tm < _FUSED_TM_THRESHOLD          # rank-1 reformulation for small batches

    # Only small operands are padded per call (weights were padded once at init).
    xp = x if (Mp == B and Kp == K) else jnp.pad(x, ((0, Mp - B), (0, Kp - K)))
    bmu = jnp.pad(params["bias_mu"], (0, Np - N)).reshape(1, Np)

    if single_k:
        grid = (Mp // tm, Np // tn)
        x_spec = pl.BlockSpec((tm, tk), lambda i, j: (i, 0))
        w_spec = pl.BlockSpec((tk, tn), lambda i, j: (0, j))
        row_k_spec = pl.BlockSpec((1, tk), lambda i, j: (0, 0))
        col_k_spec = pl.BlockSpec((tk, 1), lambda i, j: (0, 0))
        row_n_spec = pl.BlockSpec((1, tn), lambda i, j: (0, j))
        out_spec = pl.BlockSpec((tm, tn), lambda i, j: (i, j))
        dim_sems = ("parallel", "parallel")
        scratch = []
    else:
        grid = (Mp // tm, Np // tn, Kp // tk)
        x_spec = pl.BlockSpec((tm, tk), lambda i, j, k: (i, k))
        w_spec = pl.BlockSpec((tk, tn), lambda i, j, k: (k, j))
        row_k_spec = pl.BlockSpec((1, tk), lambda i, j, k: (0, k))
        col_k_spec = pl.BlockSpec((tk, 1), lambda i, j, k: (k, 0))
        row_n_spec = pl.BlockSpec((1, tn), lambda i, j, k: (0, j))
        out_spec = pl.BlockSpec((tm, tn), lambda i, j, k: (i, j))
        dim_sems = ("parallel", "parallel", "arbitrary")
        scratch = [pltpu.VMEM((tm, tn), jnp.float32)]

    compiler_params = pltpu.CompilerParams(
        dimension_semantics=dim_sems, vmem_limit_bytes=_VMEM_LIMIT_BYTES)

    n_m_tiles = Mp // tm
    flops = 2 * Mp * Kp * Np * (2 if (training and rank1) else 1)
    bytes_accessed = 4 * (Mp * Kp + n_w * Kp * Np * n_m_tiles + Mp * Np
                          + (n_w + 1) * Np + Kp)
    cost = pl.CostEstimate(flops=flops, transcendentals=0,
                           bytes_accessed=bytes_accessed)
    out_shape = jax.ShapeDtypeStruct((Mp, Np), x.dtype)

    if training:
        eps_in = jnp.pad(params["eps_in"], (0, Kp - K))
        eps_in2d = eps_in.reshape(1, Kp) if rank1 else eps_in.reshape(Kp, 1)
        eps_in_spec = row_k_spec if rank1 else col_k_spec
        eps_out = jnp.pad(params["eps_out"], (0, Np - N)).reshape(1, Np)
        bsig = jnp.pad(params["bias_sigma"], (0, Np - N)).reshape(1, Np)

        kernel = functools.partial(
            _train_kernel_single if single_k else _train_kernel_reduce, rank1)
        in_specs = [x_spec, w_spec, w_spec, eps_in_spec,
                    row_n_spec, row_n_spec, row_n_spec]
        operands = (xp, params["weight_mu"], params["weight_sigma"],
                    eps_in2d, eps_out, bmu, bsig)
    else:
        kernel = _eval_kernel_single if single_k else _eval_kernel_reduce
        in_specs = [x_spec, w_spec, row_n_spec]
        operands = (xp, params["weight_mu"], bmu)

    yp = pl.pallas_call(
        kernel,
        out_shape=out_shape,
        grid_spec=pltpu.PrefetchScalarGridSpec(
            num_scalar_prefetch=0,
            grid=grid,
            in_specs=in_specs,
            out_specs=out_spec,
            scratch_shapes=scratch),
        compiler_params=compiler_params,
        cost_estimate=cost,
    )(*operands)

    return yp[:B, :N]


# ------------------------- parameter init / noise -------------------------

def _scale_noise(key, size):
    x = jax.random.normal(key, (size,), dtype=jnp.float32)
    return jnp.sign(x) * jnp.sqrt(jnp.abs(x))


def init_noisy_linear(key, in_features, out_features, std_init=0.4):
    """Parameters in kernel-native (in_features, out_features) layout.

    weight_mu / weight_sigma are zero-padded ONCE here to lane-aligned (Kp, Np); the
    zero fill keeps the K reduction exact and the padded output columns are sliced off
    in the wrapper.  The full weight_epsilon matrix is never materialised (rank-1
    factors eps_in / eps_out only)."""
    Kp = _round_up(in_features, _LANE)
    Np = _round_up(out_features, _LANE)

    k_wmu, k_bmu, k_ein, k_eout = jax.random.split(key, 4)
    mu_range = 1.0 / math.sqrt(in_features)

    weight_mu = jax.random.uniform(k_wmu, (in_features, out_features),
                                   minval=-mu_range, maxval=mu_range,
                                   dtype=jnp.float32)
    weight_sigma = jnp.full((in_features, out_features),
                            std_init / math.sqrt(in_features), dtype=jnp.float32)
    pad = ((0, Kp - in_features), (0, Np - out_features))
    weight_mu = jnp.pad(weight_mu, pad)
    weight_sigma = jnp.pad(weight_sigma, pad)

    bias_mu = jax.random.uniform(k_bmu, (out_features,),
                                 minval=-mu_range, maxval=mu_range, dtype=jnp.float32)
    bias_sigma = jnp.full((out_features,),
                          std_init / math.sqrt(out_features), dtype=jnp.float32)

    eps_in = _scale_noise(k_ein, in_features)
    eps_out = _scale_noise(k_eout, out_features)   # bias_epsilon == eps_out

    return {
        "weight_mu": weight_mu,
        "weight_sigma": weight_sigma,
        "bias_mu": bias_mu,
        "bias_sigma": bias_sigma,
        "eps_in": eps_in,
        "eps_out": eps_out,
    }


def reset_noise(key, params):
    """Equivalent of NoisyLinear.reset_noise(): resample the factorised noise."""
    k_in, k_out = jax.random.split(key)
    new = dict(params)
    new["eps_in"] = _scale_noise(k_in, params["eps_in"].shape[0])
    new["eps_out"] = _scale_noise(k_out, params["eps_out"].shape[0])
    return new


# ------------------------- pure-JAX reference -------------------------

def noisy_linear_ref(x, p, *, training=True):
    K = x.shape[1]
    N = p["bias_mu"].shape[0]
    w_mu = p["weight_mu"][:K, :N]
    if training:
        eps_w = jnp.outer(p["eps_in"], p["eps_out"])              # (in, out)
        w = w_mu + p["weight_sigma"][:K, :N] * eps_w
        b = p["bias_mu"] + p["bias_sigma"] * p["eps_out"]
    else:
        w, b = w_mu, p["bias_mu"]
    return x @ w + b


# ------------------------- main -------------------------

def _check(name, got, want, atol, rtol):
    assert got.shape == want.shape, f"{name}: shape {got.shape} vs {want.shape}"
    assert jnp.allclose(got, want, atol=atol, rtol=rtol), f"mismatch vs reference: {name}"


if __name__ == "__main__":
    key = jax.random.PRNGKey(0)
    keys = jax.random.split(key, 6)

    fwd_train = jax.jit(functools.partial(noisy_linear_forward, training=True))
    fwd_eval = jax.jit(functools.partial(noisy_linear_forward, training=False))
    # Test hook: force a K-tiled reduction grid to exercise the accumulator kernels.
    fwd_train_kt = jax.jit(functools.partial(noisy_linear_forward, training=True,
                                             max_tk=128))
    fwd_eval_kt = jax.jit(functools.partial(noisy_linear_forward, training=False,
                                            max_tk=128))

    # --- 1. small module-scale shape (rank-1, single-pass, grid (1,1)) ---
    B, K, N = 8, 32, 64
    p1 = init_noisy_linear(keys[0], K, N, std_init=0.4)
    x1 = jax.random.normal(keys[1], (B, K), dtype=jnp.float32)
    y = fwd_train(x1, p1)
    jax.block_until_ready(y)
    _check("train small", y, noisy_linear_ref(x1, p1, training=True), 1e-4, 1e-4)
    y = fwd_eval(x1, p1)
    jax.block_until_ready(y)
    _check("eval small", y, noisy_linear_ref(x1, p1, training=False), 1e-4, 1e-4)

    # --- 2. non-power-of-two shape, multi-N-tile parallel grid (rank-1, single-pass) ---
    B2, K2, N2 = 128, 640, 384
    p2 = init_noisy_linear(keys[2], K2, N2, std_init=0.4)
    x2 = jax.random.normal(keys[3], (B2, K2), dtype=jnp.float32)
    y = fwd_train(x2, p2)
    jax.block_until_ready(y)
    _check("train tiled", y, noisy_linear_ref(x2, p2, training=True), 2e-3, 1e-3)
    y = fwd_eval(x2, p2)
    jax.block_until_ready(y)
    _check("eval tiled", y, noisy_linear_ref(x2, p2, training=False), 2e-3, 1e-3)

    # --- 3. larger batch -> fused weight-composition path (tm >= 256, single-pass) ---
    B3, K3, N3 = 256, 320, 256
    p3 = init_noisy_linear(keys[4], K3, N3, std_init=0.4)
    x3 = jax.random.normal(keys[5], (B3, K3), dtype=jnp.float32)
    y = fwd_train(x3, p3)
    jax.block_until_ready(y)
    _check("train fused", y, noisy_linear_ref(x3, p3, training=True), 2e-3, 1e-3)

    # --- 4. forced K-tiled grids (reduction kernels with VMEM accumulator) ---
    y = fwd_train_kt(x2, p2)
    jax.block_until_ready(y)
    _check("train rank1 K-tiled", y, noisy_linear_ref(x2, p2, training=True), 2e-3, 1e-3)
    y = fwd_train_kt(x3, p3)
    jax.block_until_ready(y)
    _check("train fused K-tiled", y, noisy_linear_ref(x3, p3, training=True), 2e-3, 1e-3)
    y = fwd_eval_kt(x2, p2)
    jax.block_until_ready(y)
    _check("eval K-tiled", y, noisy_linear_ref(x2, p2, training=False), 2e-3, 1e-3)

    # --- noise resampling path (reset_noise equivalent) ---
    p1b = reset_noise(jax.random.PRNGKey(7), p1)
    y = fwd_train(x1, p1b)
    jax.block_until_ready(y)
    _check("train resampled noise", y, noisy_linear_ref(x1, p1b, training=True), 1e-4, 1e-4)

    print("KERNEL_OK")
</pallas_src>

<mosaic_0001>
module attributes {stable_mosaic.version = 11 : i64} {
  func.func @_train_kernel_single(%arg0: i32, %arg1: i32, %arg2: memref<8x128xf32, #tpu.memory_space<vmem>>, %arg3: memref<128x128xf32, #tpu.memory_space<vmem>>, %arg4: memref<128x128xf32, #tpu.memory_space<vmem>>, %arg5: memref<1x128xf32, #tpu.memory_space<vmem>>, %arg6: memref<1x128xf32, #tpu.memory_space<vmem>>, %arg7: memref<1x128xf32, #tpu.memory_space<vmem>>, %arg8: memref<1x128xf32, #tpu.memory_space<vmem>>, %arg9: memref<8x128xf32, #tpu.memory_space<vmem>>) attributes {dimension_semantics = [#tpu.dimension_semantics<parallel>, #tpu.dimension_semantics<parallel>], iteration_bounds = array<i64: 1, 1>, scalar_prefetch = 0 : i64, scratch_operands = 0 : i64, tpu.core_type = #tpu.core_type<tc>, window_params = [{transform_indices = @transform_0, window_bounds = array<i64: 8, 128>}, {transform_indices = @transform_1, window_bounds = array<i64: 128, 128>}, {transform_indices = @transform_2, window_bounds = array<i64: 128, 128>}, {pipeline_mode = #tpu.pipeline_mode<synchronous>, transform_indices = @transform_3, window_bounds = array<i64: 1, 128>}, {transform_indices = @transform_4, window_bounds = array<i64: 1, 128>}, {transform_indices = @transform_5, window_bounds = array<i64: 1, 128>}, {transform_indices = @transform_6, window_bounds = array<i64: 1, 128>}, {transform_indices = @transform_7, window_bounds = array<i64: 8, 128>}]} {
    %c0 = arith.constant 0 : index
    %c0_0 = arith.constant 0 : index
    %0 = vector.load %arg7[%c0, %c0_0] : memref<1x128xf32, #tpu.memory_space<vmem>>, vector<1x128xf32>
    %c0_1 = arith.constant 0 : index
    %c0_2 = arith.constant 0 : index
    %1 = vector.load %arg8[%c0_1, %c0_2] : memref<1x128xf32, #tpu.memory_space<vmem>>, vector<1x128xf32>
    %c0_3 = arith.constant 0 : index
    %c0_4 = arith.constant 0 : index
    %2 = vector.load %arg6[%c0_3, %c0_4] : memref<1x128xf32, #tpu.memory_space<vmem>>, vector<1x128xf32>
    %3 = arith.mulf %1, %2 : vector<1x128xf32>
    %4 = arith.addf %0, %3 : vector<1x128xf32>
    %c0_5 = arith.constant 0 : index
    %c0_6 = arith.constant 0 : index
    %5 = vector.load %arg2[%c0_5, %c0_6] : memref<8x128xf32, #tpu.memory_space<vmem>>, vector<8x128xf32>
    %c0_7 = arith.constant 0 : index
    %c0_8 = arith.constant 0 : index
    %6 = vector.load %arg3[%c0_7, %c0_8] : memref<128x128xf32, #tpu.memory_space<vmem>>, vector<128x128xf32>
    %cst = arith.constant dense<0.000000e+00> : vector<8x128xf32>
    %7 = tpu.matmul %5, %6, %cst {dimension_numbers = #tpu.dot_dimension_numbers<[1], [0], [0], [1], [0, 0, 1, 1], [], []>} : vector<8x128xf32>, vector<128x128xf32>, vector<8x128xf32> -> vector<8x128xf32>
    %c0_9 = arith.constant 0 : index
    %c0_10 = arith.constant 0 : index
    %8 = vector.load %arg6[%c0_9, %c0_10] : memref<1x128xf32, #tpu.memory_space<vmem>>, vector<1x128xf32>
    %c0_11 = arith.constant 0 : index
    %c0_12 = arith.constant 0 : index
    %9 = vector.load %arg2[%c0_11, %c0_12] : memref<8x128xf32, #tpu.memory_space<vmem>>, vector<8x128xf32>
    %c0_13 = arith.constant 0 : index
    %c0_14 = arith.constant 0 : index
    %10 = vector.load %arg5[%c0_13, %c0_14] : memref<1x128xf32, #tpu.memory_space<vmem>>, vector<1x128xf32>
    %11 = vector.broadcast %10 : vector<1x128xf32> to vector<8x128xf32>
    %12 = arith.mulf %9, %11 : vector<8x128xf32>
    %c0_15 = arith.constant 0 : index
    %c0_16 = arith.constant 0 : index
    %13 = vector.load %arg4[%c0_15, %c0_16] : memref<128x128xf32, #tpu.memory_space<vmem>>, vector<128x128xf32>
    %cst_17 = arith.constant dense<0.000000e+00> : vector<8x128xf32>
    %14 = tpu.matmul %12, %13, %cst_17 {dimension_numbers = #tpu.dot_dimension_numbers<[1], [0], [0], [1], [0, 0, 1, 1], [], []>} : vector<8x128xf32>, vector<128x128xf32>, vector<8x128xf32> -> vector<8x128xf32>
    %15 = vector.broadcast %8 : vector<1x128xf32> to vector<8x128xf32>
    %16 = arith.mulf %15, %14 : vector<8x128xf32>
    %17 = arith.addf %7, %16 : vector<8x128xf32>
    %18 = vector.broadcast %4 : vector<1x128xf32> to vector<8x128xf32>
    %19 = arith.addf %17, %18 : vector<8x128xf32>
    %c0_18 = arith.constant 0 : index
    %c0_19 = arith.constant 0 : index
    %20 = vector.load %arg9[%c0_18, %c0_19] : memref<8x128xf32, #tpu.memory_space<vmem>>, vector<8x128xf32>
    tpu.vector_store %arg9[%c0_18, %c0_19], %19 {strides = array<i32>} : memref<8x128xf32, #tpu.memory_space<vmem>>, vector<8x128xf32>,
    return
  }
  func.func @transform_0(%arg0: i32, %arg1: i32) -> (i32, i32) {
    %c0_i32 = arith.constant 0 : i32
    %c0_i32_0 = arith.constant 0 : i32
    return %arg0, %c0_i32 : i32, i32
  }
  func.func @transform_1(%arg0: i32, %arg1: i32) -> (i32, i32) {
    %c0_i32 = arith.constant 0 : i32
    %c0_i32_0 = arith.constant 0 : i32
    return %c0_i32, %arg1 : i32, i32
  }
  func.func @transform_2(%arg0: i32, %arg1: i32) -> (i32, i32) {
    %c0_i32 = arith.constant 0 : i32
    %c0_i32_0 = arith.constant 0 : i32
    return %c0_i32, %arg1 : i32, i32
  }
  func.func @transform_3(%arg0: i32, %arg1: i32) -> (i32, i32) {
    %c0_i32 = arith.constant 0 : i32
    %c0_i32_0 = arith.constant 0 : i32
    %c0_i32_1 = arith.constant 0 : i32
    return %c0_i32, %c0_i32_0 : i32, i32
  }
  func.func @transform_4(%arg0: i32, %arg1: i32) -> (i32, i32) {
    %c0_i32 = arith.constant 0 : i32
    %c0_i32_0 = arith.constant 0 : i32
    return %c0_i32, %arg1 : i32, i32
  }
  func.func @transform_5(%arg0: i32, %arg1: i32) -> (i32, i32) {
    %c0_i32 = arith.constant 0 : i32
    %c0_i32_0 = arith.constant 0 : i32
    return %c0_i32, %arg1 : i32, i32
  }
  func.func @transform_6(%arg0: i32, %arg1: i32) -> (i32, i32) {
    %c0_i32 = arith.constant 0 : i32
    %c0_i32_0 = arith.constant 0 : i32
    return %c0_i32, %arg1 : i32, i32
  }
  func.func @transform_7(%arg0: i32, %arg1: i32) -> (i32, i32) {
    %c0_i32 = arith.constant 0 : i32
    return %arg0, %arg1 : i32, i32
  }
}

</mosaic_0001>

<bundles_post_ra>
// kernel: noisy_linear_forward.1
= control target key start
LH: loop header
LB: loop body
LE: loop exit
PB: predicated region body
PF: predicated region fallthrough
CT: control target
= control target key end

     0   :  { %12 = vsyncpa [#allocation3], 0  ;;  %s326_s0 = inlined_call_operand.vmem [shape: f32[8,128], index: 0, kind: input, shape index: {}]   ;;  %s327_s1 = inlined_call_operand.hbm [shape: f32[128,128], index: 1, kind: input, shape index: {}]   ;;  %s328_s2 = inlined_call_operand.hbm [shape: f32[128,128], index: 2, kind: input, shape index: {}]   ;;  %s329_s3 = inlined_call_operand.vmem [shape: f32[1,128], index: 3, kind: input, shape index: {}]   ;;  %s330_s4 = inlined_call_operand.vmem [shape: f32[1,128], index: 4, kind: input, shape index: {}]   ;;  %s331_s5 = inlined_call_operand.vmem [shape: f32[1,128], index: 5, kind: input, shape index: {}]   ;;  %s332_s6 = inlined_call_operand.vmem [shape: f32[1,128], index: 6, kind: input, shape index: {}]   ;;  %s333_s7 = inlined_call_operand.hbm [shape: f32[8,128], index: 7, kind: output, shape index: {}]  }
   0x1   :  { %13 = vsyncpa [#allocation6], 0 }
   0x2   :  { %14 = vsyncpa [#allocation4], 0  ;;  %s21_s26 = sshll.u32 %s327_s1, 4  ;;  %s254_s27 = smov [#allocation2]   ;;  %s22_s26 = int_to_ptr.hbm [resolvable:$true] %s21_s26 }
   0x3   :  { %s23_s28 = sshll.u32 %s254_s27, 4  ;;  %s34_s8 = sshll.u32 %s328_s2, 4  ;;  %s24_s28 = int_to_ptr.vmem [resolvable:$true] %s23_s28  ;;  %s35_s8 = int_to_ptr.hbm [resolvable:$true] %s34_s8 }
   0x4   :  { %s255_s9 = smov 128   ;;  %s256_s10 = smov 8  }
   0x5   :  { %29 = dma.hbm_to_vmem [thread:$0]  %s22_s26, 2048, %s24_s28, [#allocation3], %s255_s9, %s255_s9, %s256_s10  }
   0x6   :  { %s257_s11 = smov [#allocation5]  }
   0x7   :  { %s36_s12 = sshll.u32 %s257_s11, 4  ;;  %s37_s12 = int_to_ptr.vmem [resolvable:$true] %s36_s12 }
   0x8   :  { %42 = dma.hbm_to_vmem [thread:$0]  %s35_s8, 2048, %s37_s12, [#allocation6], %s255_s9, %s255_s9, %s256_s10  }
   0x9   :  { %248 = dma.done.wait [#allocation3], 2048  }
   0xa   :  { %249 = vsyncadd [#allocation3], 4294965248 }
   0xb   :  { %250 = dma.done.wait [#allocation6], 2048  }
   0xc   :  { %251 = vsyncadd [#allocation6], 4294965248  ;;  %v101_v0 = vld [vmem:[#allocation5 + $0x78] sm:$0xff]  ;;  %v100_v1 = vld [vmem:[#allocation5 + $0x70] sm:$0xff]  ;;  %s258_s21 = smov [#allocation7]   ;;  %s158_s24 = sshll.u32 %s333_s7, 4  ;;  %s159_s24 = int_to_ptr.hbm [resolvable:$true] %s158_s24 }
   0xd   :  { %v80_v2 = vld [vmem:[#allocation2 + $0x78] sm:$0xff]  ;;  %102 = vmatpush.msra.mxu0 %v101_v0  ;;  %v79_v3 = vld [vmem:[#allocation2 + $0x70] sm:$0xff]  ;;  %v99_v4 = vld [vmem:[#allocation5 + $0x68] sm:$0xff] }
   0xe   :  { %126 = vmatpush.msra.mxu1 %v80_v2  ;;  %v78_v5 = vld [vmem:[#allocation2 + $0x68] sm:$0xff]  ;;  %v98_v6 = vld [vmem:[#allocation5 + $0x60] sm:$0xff]  ;;  %v97_v8 = vld [vmem:[#allocation5 + $0x58] sm:$0xff] }
   0xf   :  { %103 = vmatpush.msra.mxu0 %v100_v1  ;;  %v77_v7 = vld [vmem:[#allocation2 + $0x60] sm:$0xff]  ;;  %v76_v9 = vld [vmem:[#allocation2 + $0x58] sm:$0xff]  ;;  %v96_v10 = vld [vmem:[#allocation5 + $0x50] sm:$0xff] }
  0x10   :  { %127 = vmatpush.msra.mxu1 %v79_v3  ;;  %v75_v11 = vld [vmem:[#allocation2 + $0x50] sm:$0xff]  ;;  %v95_v12 = vld [vmem:[#allocation5 + $0x48] sm:$0xff]  ;;  %v94_v14 = vld [vmem:[#allocation5 + $0x40] sm:$0xff] }
  0x11   :  { %104 = vmatpush.msra.mxu0 %v99_v4  ;;  %v74_v13 = vld [vmem:[#allocation2 + $0x48] sm:$0xff]  ;;  %v73_v15 = vld [vmem:[#allocation2 + $0x40] sm:$0xff]  ;;  %v93_v16 = vld [vmem:[#allocation5 + $0x38] sm:$0xff] }
  0x12   :  { %128 = vmatpush.msra.mxu1 %v78_v5  ;;  %v72_v17 = vld [vmem:[#allocation2 + $0x38] sm:$0xff]  ;;  %v92_v18 = vld [vmem:[#allocation5 + $0x30] sm:$0xff]  ;;  %v91_v20 = vld [vmem:[#allocation5 + $0x28] sm:$0xff] }
  0x13   :  { %105 = vmatpush.msra.mxu0 %v98_v6  ;;  %v71_v19 = vld [vmem:[#allocation2 + $0x30] sm:$0xff]  ;;  %v70_v21 = vld [vmem:[#allocation2 + $0x28] sm:$0xff]  ;;  %v90_v22 = vld [vmem:[#allocation5 + $0x20] sm:$0xff] }
  0x14   :  { %129 = vmatpush.msra.mxu1 %v77_v7  ;;  %v69_v23 = vld [vmem:[#allocation2 + $0x20] sm:$0xff]  ;;  %v89_v24 = vld [vmem:[#allocation5 + $0x18] sm:$0xff]  ;;  %v88_v26 = vld [vmem:[#allocation5 + $0x10] sm:$0xff] }
  0x15   :  { %106 = vmatpush.msra.mxu0 %v97_v8  ;;  %v68_v25 = vld [vmem:[#allocation2 + $0x18] sm:$0xff]  ;;  %v67_v27 = vld [vmem:[#allocation2 + $0x10] sm:$0xff]  ;;  %v174_v28 = vld [vmem:[%s329_s3] ss:$0 sm:$0xff] }
  0x16   :  { %130 = vmatpush.msra.mxu1 %v76_v9  ;;  %v64_v29 = vld [vmem:[%s326_s0] sm:$0xff]  ;;  %v87_v30 = vld [vmem:[#allocation5 + $0x8] sm:$0xff] }
  0x17   :  { %107 = vmatpush.msra.mxu0 %v96_v10  ;;  %v66_v31 = vld [vmem:[#allocation2 + $0x8] sm:$0xff]  ;;  %v86_v32 = vld [vmem:[#allocation5] sm:$0xff]  ;;  %v85_v33 = vmul.f32 %v174_v28, %v64_v29 }
  0x18   :  { %131 = vmatpush.msra.mxu1 %v75_v11  ;;  %v65_v34 = vld [vmem:[#allocation2] sm:$0xff] }
  0x19   :  { %108 = vmatpush.msra.mxu0 %v95_v12  ;;  %v60_v35 = vld [vmem:[%s332_s6] sm:$0x1]  ;;  %s156_s6 = sshll.u32 %s258_s21, 4  ;;  %s157_s6 = int_to_ptr.vmem [resolvable:$true] %s156_s6 }
  0x1a   :  { %132 = vmatpush.msra.mxu1 %v74_v13  ;;  %v61_v36 = vld [vmem:[%s330_s4] sm:$0x1] }
  0x1b   :  { %109 = vmatpush.msra.mxu0 %v94_v14  ;;  %v62_v37 = vmul.f32 %v61_v36, %v60_v35  ;;  %v59_v38 = vld [vmem:[%s331_s5] sm:$0x1] }
  0x1c   :  { %133 = vmatpush.msra.mxu1 %v73_v15  ;;  %v175_v39 = vld [vmem:[%s330_s4] ss:$0 sm:$0xff] }
  0x1d   :  { %110 = vmatpush.msra.mxu0 %v93_v16  ;;  %v63_v40 = vadd.f32 %v62_v37, %v59_v38 }
  0x1e   :  { %134 = vmatpush.msra.mxu1 %v72_v17 }
  0x1f   :  { %111 = vmatpush.msra.mxu0 %v92_v18  ;;  %v147_v44 = vperm.slane %v63_v40, 0 }
  0x20   :  { %135 = vmatpush.msra.mxu1 %v71_v19 }
  0x21   :  { %112 = vmatpush.msra.mxu0 %v91_v20 }
  0x22   :  { %136 = vmatpush.msra.mxu1 %v70_v21 }
  0x23   :  { %113 = vmatpush.msra.mxu0 %v90_v22 }
  0x24   :  { %137 = vmatpush.msra.mxu1 %v69_v23 }
  0x25   :  { %114 = vmatpush.msra.mxu0 %v89_v24 }
  0x26   :  { %138 = vmatpush.msra.mxu1 %v68_v25 }
  0x27   :  { %115 = vmatpush.msra.mxu0 %v88_v26 }
  0x28   :  { %139 = vmatpush.msra.mxu1 %v67_v27 }
  0x29   :  { %116 = vmatpush.msra.mxu0 %v87_v30 }
  0x2a   :  { %140 = vmatpush.msra.mxu1 %v66_v31 }
  0x2b   :  { %117 = vmatpush.msra.mxu0 %v86_v32 }
  0x2c   :  { %141 = vmatpush.msra.mxu1 %v65_v34  ;;  %118 = vmatmul.f32.vlgmr.msra.gmra.mxu0 %v85_v33 }
  0x2d   :  { %142 = vmatmul.f32.vlgmr.msra.gmra.mxu1 %v64_v29 }
  0xa9   :  { %v119_v41 = vpop.f32.mrf.mxu0 }
  0xaa   :  { %v143_v42 = vpop.f32.mrf.mxu1  ;;  %v125_v43 = vmul.f32 %v175_v39, %v119_v41 }
  0xac   :  { %v144_v45 = vadd.f32 %v143_v42, %v125_v43 }
  0xae   :  { %v149_v46 = vadd.f32 %v147_v44, %v144_v45 }
  0xb0   :  { %150 = vst [vmem:[#allocation7] sm:$0xff] %v149_v46 }
  0xb1   :  { %161 = dma.vmem_to_hbm [thread:$0]  %s157_s6, 128, %s159_s24, [#allocation4]  }
  0xb2   :  { %252 = dma.done.wait [#allocation4], 128  }
  0xb3   :  { %253 = vsyncadd [#allocation4], 4294967168 }
  0xb4   :  { %166 = vsyncpa [#allocation3], 1 }
  0xb5   :  { %167 = vsyncpa [#allocation6], 1 }
  0xb6   :  { %168 = vsyncpa [#allocation4], 1 }

</bundles_post_ra>
